<compile_context>
chip_gen: v7x
topology: tpu7x:2x2x1
jax: 0.10.0
libtpu: 0.0.40
codegen_flags: <defaults>
</compile_context>

<pallas_src>
import jax
import jax.numpy as jnp
from jax.experimental import pallas as pl
from jax.experimental.pallas import tpu as pltpu


_DISC_LANES = 128                      # lane-dense disc output width
_TILE_BUDGET_BYTES = 8 * 1024 * 1024   # budget for streamed S-tiles (x2 buffers)
_VMEM_LIMIT_BYTES = 48 * 1024 * 1024   # explicit scoped VMEM limit (< 64 MiB v7x)


def _round_up(x, m):
    return ((x + m - 1) // m) * m


def div_encoder_kernel(inl_ref, ino_ref, w_ref,
                       wenc_ref, benc_ref, wd1_ref, bd1_ref, wd2r_ref, bd2_ref,
                       encl_ref, enco_ref, disc_ref,
                       accl_ref, acco_ref):
    s = pl.program_id(1)
    n_s = pl.num_programs(1)

    # ---- init accumulators for this batch tile --------------------------------
    @pl.when(s == 0)
    def _init():
        accl_ref[...] = jnp.zeros_like(accl_ref)
        acco_ref[...] = jnp.zeros_like(acco_ref)

    # ---- streamed masked-average pool over this S tile -------------------------
    # w already folds mask AND 1/length (and is 0 for padded rows), so the
    # running sum IS the masked average once all S tiles are consumed.
    wt = w_ref[...]                                          # (tS, tB, 1)
    accl_ref[...] += jnp.sum(inl_ref[...] * wt, axis=0)      # (tB, Dp)
    acco_ref[...] += jnp.sum(ino_ref[...] * wt, axis=0)      # (tB, Dp)

    # ---- finalize: fused encoder matmul + discriminator MLP --------------------
    @pl.when(s == n_s - 1)
    def _finalize():
        tb = accl_ref.shape[0]
        hp = encl_ref.shape[-1]
        lanes = disc_ref.shape[-1]

        # one MXU call for both encoders: block-diagonal weight (2Dp, 2Hp)
        avg = jnp.concatenate([accl_ref[...], acco_ref[...]], axis=-1)   # (tB, 2Dp)
        enc_both = jnp.dot(avg, wenc_ref[...],
                           preferred_element_type=jnp.float32) + benc_ref[...]  # (tB, 2Hp)
        enc_l = enc_both[:, :hp]
        enc_o = enc_both[:, hp:]
        encl_ref[...] = enc_l
        enco_ref[...] = enc_o

        # discriminator: Linear(H,4H) -> ReLU -> (lane-reduce head) -> Sigmoid
        x = jnp.concatenate([enc_l, enc_o], axis=0)                       # (2tB, Hp)
        h1 = jnp.dot(x, wd1_ref[...],
                     preferred_element_type=jnp.float32) + bd1_ref[...]   # (2tB, H4p)
        h1 = jnp.maximum(h1, 0.0)
        logits = jnp.sum(h1 * wd2r_ref[...], axis=-1, keepdims=True) + bd2_ref[...]  # (2tB, 1)
        dvals = jax.nn.sigmoid(logits)
        # lane-dense stores (slice column 0 in the wrapper)
        disc_ref[0, :, :] = jnp.broadcast_to(dvals[:tb], (tb, lanes))
        disc_ref[1, :, :] = jnp.broadcast_to(dvals[tb:], (tb, lanes))


def div_encoder_forward(input_l, input_o, lengths, mask, params):
    """Pallas-backed forward of DIVEncoder(linear, reduce='avg', use_disc=True)."""
    S, B, D = input_l.shape
    H = params["wl"].shape[1]
    H4 = params["wd1"].shape[1]
    f32 = jnp.float32

    # ---- padded, lane-dense shapes ---------------------------------------------
    Dp = _round_up(D, 128)
    Hp = _round_up(H, 128)
    H4p = _round_up(H4, 128)
    Bp = _round_up(B, 8)
    tB = 8

    # S tile sized against the VMEM budget (2 streamed inputs + w, x2 buffers)
    bytes_per_s_row = (2 * tB * Dp + tB) * 4
    tS = max(1, min(S, _TILE_BUDGET_BYTES // (2 * bytes_per_s_row)))
    Sp = _round_up(S, tS)
    nS = Sp // tS
    nB = Bp // tB

    # ---- wrapper-side glue: mask/length weights + padded inputs ----------------
    lengths_f = jnp.maximum(lengths.astype(f32), 1.0)        # clamp: no inf at len=0
    w = mask.astype(f32) / lengths_f[:, None]                # (B, S)
    w_p = jnp.zeros((Sp, Bp, 1), f32).at[:S, :B, 0].set(w.T)

    inl_p = jnp.zeros((Sp, Bp, Dp), f32).at[:S, :B, :D].set(input_l.astype(f32))
    ino_p = jnp.zeros((Sp, Bp, Dp), f32).at[:S, :B, :D].set(input_o.astype(f32))

    # ---- fused / padded weights -------------------------------------------------
    wenc = (jnp.zeros((2 * Dp, 2 * Hp), f32)
            .at[:D, :H].set(params["wl"])
            .at[Dp:Dp + D, Hp:Hp + H].set(params["wo"]))
    benc = (jnp.zeros((1, 2 * Hp), f32)
            .at[:, :H].set(params["bl"])
            .at[:, Hp:Hp + H].set(params["bo"]))
    wd1p = jnp.zeros((Hp, H4p), f32).at[:H, :H4].set(params["wd1"])
    bd1p = jnp.zeros((1, H4p), f32).at[:, :H4].set(params["bd1"])
    wd2r = jnp.zeros((1, H4p), f32).at[:, :H4].set(params["wd2"].T)
    bd2 = params["bd2"].astype(f32).reshape(1, 1)

    out_shapes = (
        jax.ShapeDtypeStruct((Bp, Hp), f32),
        jax.ShapeDtypeStruct((Bp, Hp), f32),
        jax.ShapeDtypeStruct((2, Bp, _DISC_LANES), f32),
    )

    in_specs = [
        pl.BlockSpec((tS, tB, Dp), lambda b, s: (s, b, 0)),   # input_l tiles
        pl.BlockSpec((tS, tB, Dp), lambda b, s: (s, b, 0)),   # input_o tiles
        pl.BlockSpec((tS, tB, 1), lambda b, s: (s, b, 0)),    # mask/len weights
        pl.BlockSpec((2 * Dp, 2 * Hp), lambda b, s: (0, 0)),  # fused enc weight
        pl.BlockSpec((1, 2 * Hp), lambda b, s: (0, 0)),       # fused enc bias
        pl.BlockSpec((Hp, H4p), lambda b, s: (0, 0)),         # disc layer-1 W
        pl.BlockSpec((1, H4p), lambda b, s: (0, 0)),          # disc layer-1 b
        pl.BlockSpec((1, H4p), lambda b, s: (0, 0)),          # disc layer-2 W row
        pl.BlockSpec((1, 1), lambda b, s: (0, 0)),            # disc layer-2 b
    ]
    out_specs = (
        pl.BlockSpec((tB, Hp), lambda b, s: (b, 0)),
        pl.BlockSpec((tB, Hp), lambda b, s: (b, 0)),
        pl.BlockSpec((2, tB, _DISC_LANES), lambda b, s: (0, b, 0)),
    )

    enc_l_p, enc_o_p, disc_p = pl.pallas_call(
        div_encoder_kernel,
        out_shape=out_shapes,
        grid=(nB, nS),
        in_specs=in_specs,
        out_specs=out_specs,
        scratch_shapes=[
            pltpu.VMEM((tB, Dp), f32),   # sum_l accumulator
            pltpu.VMEM((tB, Dp), f32),   # sum_o accumulator
        ],
        compiler_params=pltpu.CompilerParams(
            dimension_semantics=("parallel", "arbitrary"),
            vmem_limit_bytes=_VMEM_LIMIT_BYTES,
        ),
    )(inl_p, ino_p, w_p, wenc, benc, wd1p, bd1p, wd2r, bd2)

    enc_l = enc_l_p[:B, :H]
    enc_o = enc_o_p[:B, :H]
    disc_out = jnp.concatenate([disc_p[0, :B, 0], disc_p[1, :B, 0]], axis=0)  # (2B,)
    disc_labels = jnp.concatenate(
        [jnp.zeros((B,), f32), jnp.ones((B,), f32)], axis=0)
    return enc_l, enc_o, disc_out, disc_labels


def init_params(key, in_size, out_size):
    """Deterministic parameter init mirroring the PyTorch shapes.
    Weights are stored already transposed to (fan_in, fan_out)."""
    ks = jax.random.split(key, 8)

    def lin(kw, kb, fan_in, fan_out):
        bound = 1.0 / jnp.sqrt(jnp.float32(fan_in))
        w = jax.random.uniform(kw, (fan_in, fan_out), jnp.float32, -bound, bound)
        b = jax.random.uniform(kb, (1, fan_out), jnp.float32, -bound, bound)
        return w, b

    wl, bl = lin(ks[0], ks[1], in_size, out_size)          # encode_l
    wo, bo = lin(ks[2], ks[3], in_size, out_size)          # encode_o
    wd1, bd1 = lin(ks[4], ks[5], out_size, 4 * out_size)   # disc layer 1
    wd2, bd2 = lin(ks[6], ks[7], 4 * out_size, 1)          # disc layer 2
    return dict(wl=wl, bl=bl, wo=wo, bo=bo,
                wd1=wd1, bd1=bd1, wd2=wd2, bd2=bd2)


def reference_forward(input_l, input_o, lengths, mask, params):
    """Pure-JAX reference of the same forward (for a correctness check)."""
    lengths_f = lengths.astype(jnp.float32)
    mask3 = mask.astype(jnp.float32)[:, :, None]           # (B, S, 1)

    def masked_avg(t):                                      # t: (S, B, D)
        mm = jnp.transpose(t, (1, 0, 2)) * mask3            # (B, S, D)
        return mm.sum(axis=1) / lengths_f[:, None]

    avg_l = masked_avg(input_l)
    avg_o = masked_avg(input_o)
    enc_l = avg_l @ params["wl"] + params["bl"]
    enc_o = avg_o @ params["wo"] + params["bo"]
    x = jnp.concatenate([enc_l, enc_o], axis=0)
    h1 = jnp.maximum(x @ params["wd1"] + params["bd1"], 0.0)
    disc = jax.nn.sigmoid(h1 @ params["wd2"] + params["bd2"])[:, 0]
    B = enc_l.shape[0]
    labels = jnp.concatenate([jnp.zeros((B,)), jnp.ones((B,))])
    return enc_l, enc_o, disc, labels


if __name__ == "__main__":
    S, B, D, H = 8, 2, 32, 32   # max_seq_len, batch, in_size, out_size

    key = jax.random.PRNGKey(0)
    k_in_l, k_in_o, k_param = jax.random.split(key, 3)

    input_l = jax.random.normal(k_in_l, (S, B, D), jnp.float32)
    input_o = jax.random.normal(k_in_o, (S, B, D), jnp.float32)
    lengths = jnp.array([8, 5], dtype=jnp.int32)            # (B,)
    # mask[b, s] = 1 if s < lengths[b]
    mask = (jnp.arange(S)[None, :] < lengths[:, None]).astype(jnp.float32)  # (B, S)

    params = init_params(k_param, D, H)

    enc_l, enc_o, disc_out, disc_labels = div_encoder_forward(
        input_l, input_o, lengths, mask, params)
    jax.block_until_ready((enc_l, enc_o, disc_out, disc_labels))

    # correctness check against a pure-JAX reference
    r_enc_l, r_enc_o, r_disc, r_labels = reference_forward(
        input_l, input_o, lengths, mask, params)
    assert jnp.allclose(enc_l, r_enc_l, atol=1e-5, rtol=1e-5)
    assert jnp.allclose(enc_o, r_enc_o, atol=1e-5, rtol=1e-5)
    assert jnp.allclose(disc_out, r_disc, atol=1e-5, rtol=1e-5)
    assert jnp.allclose(disc_labels, r_labels)

    print("KERNEL_OK")
</pallas_src>

<mosaic_0001>
module attributes {stable_mosaic.version = 11 : i64} {
  func.func @div_encoder_kernel(%arg0: i32, %arg1: i32, %arg2: memref<8x8x128xf32, #tpu.memory_space<vmem>>, %arg3: memref<8x8x128xf32, #tpu.memory_space<vmem>>, %arg4: memref<8x8x1xf32, #tpu.memory_space<vmem>>, %arg5: memref<256x256xf32, #tpu.memory_space<vmem>>, %arg6: memref<1x256xf32, #tpu.memory_space<vmem>>, %arg7: memref<128x128xf32, #tpu.memory_space<vmem>>, %arg8: memref<1x128xf32, #tpu.memory_space<vmem>>, %arg9: memref<1x128xf32, #tpu.memory_space<vmem>>, %arg10: memref<1x1xf32, #tpu.memory_space<vmem>>, %arg11: memref<8x128xf32, #tpu.memory_space<vmem>>, %arg12: memref<8x128xf32, #tpu.memory_space<vmem>>, %arg13: memref<2x8x128xf32, #tpu.memory_space<vmem>>, %arg14: memref<8x128xf32, #tpu.memory_space<vmem>>, %arg15: memref<8x128xf32, #tpu.memory_space<vmem>>) attributes {dimension_semantics = [#tpu.dimension_semantics<parallel>, #tpu.dimension_semantics<arbitrary>], iteration_bounds = array<i64: 1, 1>, scalar_prefetch = 0 : i64, scratch_operands = 2 : i64, tpu.core_type = #tpu.core_type<tc>, window_params = [{transform_indices = @transform_0, window_bounds = array<i64: 8, 8, 128>}, {transform_indices = @transform_1, window_bounds = array<i64: 8, 8, 128>}, {transform_indices = @transform_2, window_bounds = array<i64: 8, 8, 1>}, {pipeline_mode = #tpu.pipeline_mode<synchronous>, transform_indices = @transform_3, window_bounds = array<i64: 256, 256>}, {pipeline_mode = #tpu.pipeline_mode<synchronous>, transform_indices = @transform_4, window_bounds = array<i64: 1, 256>}, {pipeline_mode = #tpu.pipeline_mode<synchronous>, transform_indices = @transform_5, window_bounds = array<i64: 128, 128>}, {pipeline_mode = #tpu.pipeline_mode<synchronous>, transform_indices = @transform_6, window_bounds = array<i64: 1, 128>}, {pipeline_mode = #tpu.pipeline_mode<synchronous>, transform_indices = @transform_7, window_bounds = array<i64: 1, 128>}, {pipeline_mode = #tpu.pipeline_mode<synchronous>, transform_indices = @transform_8, window_bounds = array<i64: 1, 1>}, {transform_indices = @transform_9, window_bounds = array<i64: 8, 128>}, {transform_indices = @transform_10, window_bounds = array<i64: 8, 128>}, {transform_indices = @transform_11, window_bounds = array<i64: 2, 8, 128>}]} {
    %c0_i32 = arith.constant 0 : i32
    %0 = arith.cmpi eq, %arg1, %c0_i32 : i32
    %1 = arith.extui %0 : i1 to i32
    %c0_i32_0 = arith.constant 0 : i32
    %2 = arith.cmpi ne, %1, %c0_i32_0 : i32
    scf.if %2 {
      %cst_20 = arith.constant 0.000000e+00 : f32
      %21 = vector.broadcast %cst_20 : f32 to vector<8x128xf32>
      %c0_21 = arith.constant 0 : index
      %c0_22 = arith.constant 0 : index
      %22 = vector.load %arg14[%c0_21, %c0_22] : memref<8x128xf32, #tpu.memory_space<vmem>>, vector<8x128xf32>
      tpu.vector_store %arg14[%c0_21, %c0_22], %21 {strides = array<i32>} : memref<8x128xf32, #tpu.memory_space<vmem>>, vector<8x128xf32>,
      %cst_23 = arith.constant 0.000000e+00 : f32
      %23 = vector.broadcast %cst_23 : f32 to vector<8x128xf32>
      %c0_24 = arith.constant 0 : index
      %c0_25 = arith.constant 0 : index
      %24 = vector.load %arg15[%c0_24, %c0_25] : memref<8x128xf32, #tpu.memory_space<vmem>>, vector<8x128xf32>
      tpu.vector_store %arg15[%c0_24, %c0_25], %23 {strides = array<i32>} : memref<8x128xf32, #tpu.memory_space<vmem>>, vector<8x128xf32>,
    } else {
    }
    %c0 = arith.constant 0 : index
    %c0_1 = arith.constant 0 : index
    %c0_2 = arith.constant 0 : index
    %3 = vector.load %arg4[%c0, %c0_1, %c0_2] : memref<8x8x1xf32, #tpu.memory_space<vmem>>, vector<8x8x1xf32>
    %c0_3 = arith.constant 0 : index
    %c0_4 = arith.constant 0 : index
    %4 = vector.load %arg14[%c0_3, %c0_4] : memref<8x128xf32, #tpu.memory_space<vmem>>, vector<8x128xf32>
    %c0_5 = arith.constant 0 : index
    %c0_6 = arith.constant 0 : index
    %c0_7 = arith.constant 0 : index
    %5 = vector.load %arg2[%c0_5, %c0_6, %c0_7] : memref<8x8x128xf32, #tpu.memory_space<vmem>>, vector<8x8x128xf32>
    %6 = vector.broadcast %3 : vector<8x8x1xf32> to vector<8x8x128xf32>
    %7 = arith.mulf %5, %6 : vector<8x8x128xf32>
    %cst = arith.constant dense<0.000000e+00> : vector<8x128xf32>
    %8 = vector.multi_reduction <add>, %7, %cst [0] : vector<8x8x128xf32> to vector<8x128xf32>
    %9 = arith.addf %4, %8 : vector<8x128xf32>
    %c0_8 = arith.constant 0 : index
    %c0_9 = arith.constant 0 : index
    %10 = vector.load %arg14[%c0_8, %c0_9] : memref<8x128xf32, #tpu.memory_space<vmem>>, vector<8x128xf32>
    tpu.vector_store %arg14[%c0_8, %c0_9], %9 {strides = array<i32>} : memref<8x128xf32, #tpu.memory_space<vmem>>, vector<8x128xf32>,
    %c0_10 = arith.constant 0 : index
    %c0_11 = arith.constant 0 : index
    %11 = vector.load %arg15[%c0_10, %c0_11] : memref<8x128xf32, #tpu.memory_space<vmem>>, vector<8x128xf32>
    %c0_12 = arith.constant 0 : index
    %c0_13 = arith.constant 0 : index
    %c0_14 = arith.constant 0 : index
    %12 = vector.load %arg3[%c0_12, %c0_13, %c0_14] : memref<8x8x128xf32, #tpu.memory_space<vmem>>, vector<8x8x128xf32>
    %13 = vector.broadcast %3 : vector<8x8x1xf32> to vector<8x8x128xf32>
    %14 = arith.mulf %12, %13 : vector<8x8x128xf32>
    %cst_15 = arith.constant dense<0.000000e+00> : vector<8x128xf32>
    %15 = vector.multi_reduction <add>, %14, %cst_15 [0] : vector<8x8x128xf32> to vector<8x128xf32>
    %16 = arith.addf %11, %15 : vector<8x128xf32>
    %c0_16 = arith.constant 0 : index
    %c0_17 = arith.constant 0 : index
    %17 = vector.load %arg15[%c0_16, %c0_17] : memref<8x128xf32, #tpu.memory_space<vmem>>, vector<8x128xf32>
    tpu.vector_store %arg15[%c0_16, %c0_17], %16 {strides = array<i32>} : memref<8x128xf32, #tpu.memory_space<vmem>>, vector<8x128xf32>,
    %c0_i32_18 = arith.constant 0 : i32
    %18 = arith.cmpi eq, %arg1, %c0_i32_18 : i32
    %19 = arith.extui %18 : i1 to i32
    %c0_i32_19 = arith.constant 0 : i32
    %20 = arith.cmpi ne, %19, %c0_i32_19 : i32
    scf.if %20 {
      %c0_20 = arith.constant 0 : index
      %c0_21 = arith.constant 0 : index
      %21 = vector.load %arg14[%c0_20, %c0_21] : memref<8x128xf32, #tpu.memory_space<vmem>>, vector<8x128xf32>
      %c0_22 = arith.constant 0 : index
      %c0_23 = arith.constant 0 : index
      %22 = vector.load %arg15[%c0_22, %c0_23] : memref<8x128xf32, #tpu.memory_space<vmem>>, vector<8x128xf32>
      %23 = tpu.concatenate %21, %22 in 1 : vector<8x128xf32>, vector<8x128xf32> -> vector<8x256xf32>
      %c0_24 = arith.constant 0 : index
      %c0_25 = arith.constant 0 : index
      %24 = vector.load %arg5[%c0_24, %c0_25] : memref<256x256xf32, #tpu.memory_space<vmem>>, vector<256x256xf32>
      %cst_26 = arith.constant dense<0.000000e+00> : vector<8x256xf32>
      %25 = tpu.matmul %23, %24, %cst_26 {dimension_numbers = #tpu.dot_dimension_numbers<[1], [0], [0], [1], [0, 0, 1, 1], [], []>} : vector<8x256xf32>, vector<256x256xf32>, vector<8x256xf32> -> vector<8x256xf32>
      %c0_27 = arith.constant 0 : index
      %c0_28 = arith.constant 0 : index
      %26 = vector.load %arg6[%c0_27, %c0_28] : memref<1x256xf32, #tpu.memory_space<vmem>>, vector<1x256xf32>
      %27 = vector.broadcast %26 : vector<1x256xf32> to vector<8x256xf32>
      %28 = arith.addf %25, %27 : vector<8x256xf32>
      %29 = vector.extract_strided_slice %28 {offsets = [0, 0], sizes = [8, 128], strides = [1, 1]} : vector<8x256xf32> to vector<8x128xf32>
      %30 = vector.extract_strided_slice %28 {offsets = [0, 128], sizes = [8, 128], strides = [1, 1]} : vector<8x256xf32> to vector<8x128xf32>
      %c0_29 = arith.constant 0 : index
      %c0_30 = arith.constant 0 : index
      %31 = vector.load %arg11[%c0_29, %c0_30] : memref<8x128xf32, #tpu.memory_space<vmem>>, vector<8x128xf32>
      tpu.vector_store %arg11[%c0_29, %c0_30], %29 {strides = array<i32>} : memref<8x128xf32, #tpu.memory_space<vmem>>, vector<8x128xf32>,
      %c0_31 = arith.constant 0 : index
      %c0_32 = arith.constant 0 : index
      %32 = vector.load %arg12[%c0_31, %c0_32] : memref<8x128xf32, #tpu.memory_space<vmem>>, vector<8x128xf32>
      tpu.vector_store %arg12[%c0_31, %c0_32], %30 {strides = array<i32>} : memref<8x128xf32, #tpu.memory_space<vmem>>, vector<8x128xf32>,
      %33 = tpu.concatenate %29, %30 in 0 : vector<8x128xf32>, vector<8x128xf32> -> vector<16x128xf32>
      %c0_33 = arith.constant 0 : index
      %c0_34 = arith.constant 0 : index
      %34 = vector.load %arg7[%c0_33, %c0_34] : memref<128x128xf32, #tpu.memory_space<vmem>>, vector<128x128xf32>
      %cst_35 = arith.constant dense<0.000000e+00> : vector<16x128xf32>
      %35 = tpu.matmul %33, %34, %cst_35 {dimension_numbers = #tpu.dot_dimension_numbers<[1], [0], [0], [1], [0, 0, 1, 1], [], []>} : vector<16x128xf32>, vector<128x128xf32>, vector<16x128xf32> -> vector<16x128xf32>
      %c0_36 = arith.constant 0 : index
      %c0_37 = arith.constant 0 : index
      %36 = vector.load %arg8[%c0_36, %c0_37] : memref<1x128xf32, #tpu.memory_space<vmem>>, vector<1x128xf32>
      %37 = vector.broadcast %36 : vector<1x128xf32> to vector<16x128xf32>
      %38 = arith.addf %35, %37 : vector<16x128xf32>
      %cst_38 = arith.constant 0.000000e+00 : f32
      %39 = vector.broadcast %cst_38 : f32 to vector<16x128xf32>
      %40 = arith.maximumf %38, %39 : vector<16x128xf32>
      %c0_39 = arith.constant 0 : index
      %c0_40 = arith.constant 0 : index
      %41 = vector.load %arg9[%c0_39, %c0_40] : memref<1x128xf32, #tpu.memory_space<vmem>>, vector<1x128xf32>
      %42 = vector.broadcast %41 : vector<1x128xf32> to vector<16x128xf32>
      %43 = arith.mulf %40, %42 : vector<16x128xf32>
      %cst_41 = arith.constant dense<0.000000e+00> : vector<16xf32>
      %44 = vector.multi_reduction <add>, %43, %cst_41 [1] : vector<16x128xf32> to vector<16xf32>
      %45 = vector.shape_cast %44 : vector<16xf32> to vector<16x1xf32>
      %c0_42 = arith.constant 0 : index
      %c0_43 = arith.constant 0 : index
      %46 = vector.load %arg10[%c0_42, %c0_43] : memref<1x1xf32, #tpu.memory_space<vmem>>, vector<1x1xf32>
      %47 = vector.broadcast %46 : vector<1x1xf32> to vector<16x1xf32>
      %48 = arith.addf %45, %47 : vector<16x1xf32>
      %49 = arith.negf %48 : vector<16x1xf32>
      %50 = math.exp %49 : vector<16x1xf32>
      %cst_44 = arith.constant 1.000000e+00 : f32
      %51 = vector.broadcast %cst_44 : f32 to vector<16x1xf32>
      %52 = arith.addf %51, %50 : vector<16x1xf32>
      %53 = arith.divf %51, %52 : vector<16x1xf32>
      %54 = vector.extract_strided_slice %53 {offsets = [0, 0], sizes = [8, 1], strides = [1, 1]} : vector<16x1xf32> to vector<8x1xf32>
      %55 = vector.shape_cast %54 : vector<8x1xf32> to vector<8x1xf32>
      %56 = vector.broadcast %55 : vector<8x1xf32> to vector<8x128xf32>
      %c0_45 = arith.constant 0 : index
      %c0_46 = arith.constant 0 : index
      %c0_47 = arith.constant 0 : index
      %57 = vector.load %arg13[%c0_45, %c0_46, %c0_47] : memref<2x8x128xf32, #tpu.memory_space<vmem>>, vector<1x8x128xf32>
      %58 = vector.shape_cast %57 : vector<1x8x128xf32> to vector<8x128xf32>
      %59 = vector.shape_cast %56 : vector<8x128xf32> to vector<1x8x128xf32>
      tpu.vector_store %arg13[%c0_45, %c0_46, %c0_47], %59 {strides = array<i32>} : memref<2x8x128xf32, #tpu.memory_space<vmem>>, vector<1x8x128xf32>,
      %60 = vector.extract_strided_slice %53 {offsets = [8, 0], sizes = [8, 1], strides = [1, 1]} : vector<16x1xf32> to vector<8x1xf32>
      %61 = vector.shape_cast %60 : vector<8x1xf32> to vector<8x1xf32>
      %62 = vector.broadcast %61 : vector<8x1xf32> to vector<8x128xf32>
      %c1 = arith.constant 1 : index
      %c0_48 = arith.constant 0 : index
      %c0_49 = arith.constant 0 : index
      %63 = vector.load %arg13[%c1, %c0_48, %c0_49] : memref<2x8x128xf32, #tpu.memory_space<vmem>>, vector<1x8x128xf32>
      %64 = vector.shape_cast %63 : vector<1x8x128xf32> to vector<8x128xf32>
      %65 = vector.shape_cast %62 : vector<8x128xf32> to vector<1x8x128xf32>
      tpu.vector_store %arg13[%c1, %c0_48, %c0_49], %65 {strides = array<i32>} : memref<2x8x128xf32, #tpu.memory_space<vmem>>, vector<1x8x128xf32>,
    } else {
    }
    return
  }
  func.func @transform_0(%arg0: i32, %arg1: i32) -> (i32, i32, i32) {
    %c0_i32 = arith.constant 0 : i32
    %c0_i32_0 = arith.constant 0 : i32
    return %arg1, %arg0, %c0_i32 : i32, i32, i32
  }
  func.func @transform_1(%arg0: i32, %arg1: i32) -> (i32, i32, i32) {
    %c0_i32 = arith.constant 0 : i32
    %c0_i32_0 = arith.constant 0 : i32
    return %arg1, %arg0, %c0_i32 : i32, i32, i32
  }
  func.func @transform_2(%arg0: i32, %arg1: i32) -> (i32, i32, i32) {
    %c0_i32 = arith.constant 0 : i32
    %c0_i32_0 = arith.constant 0 : i32
    return %arg1, %arg0, %c0_i32 : i32, i32, i32
  }
  func.func @transform_3(%arg0: i32, %arg1: i32) -> (i32, i32) {
    %c0_i32 = arith.constant 0 : i32
    %c0_i32_0 = arith.constant 0 : i32
    %c0_i32_1 = arith.constant 0 : i32
    return %c0_i32, %c0_i32_0 : i32, i32
  }
  func.func @transform_4(%arg0: i32, %arg1: i32) -> (i32, i32) {
    %c0_i32 = arith.constant 0 : i32
    %c0_i32_0 = arith.constant 0 : i32
    %c0_i32_1 = arith.constant 0 : i32
    return %c0_i32, %c0_i32_0 : i32, i32
  }
  func.func @transform_5(%arg0: i32, %arg1: i32) -> (i32, i32) {
    %c0_i32 = arith.constant 0 : i32
    %c0_i32_0 = arith.constant 0 : i32
    %c0_i32_1 = arith.constant 0 : i32
    return %c0_i32, %c0_i32_0 : i32, i32
  }
  func.func @transform_6(%arg0: i32, %arg1: i32) -> (i32, i32) {
    %c0_i32 = arith.constant 0 : i32
    %c0_i32_0 = arith.constant 0 : i32
    %c0_i32_1 = arith.constant 0 : i32
    return %c0_i32, %c0_i32_0 : i32, i32
  }
  func.func @transform_7(%arg0: i32, %arg1: i32) -> (i32, i32) {
    %c0_i32 = arith.constant 0 : i32
    %c0_i32_0 = arith.constant 0 : i32
    %c0_i32_1 = arith.constant 0 : i32
    return %c0_i32, %c0_i32_0 : i32, i32
  }
  func.func @transform_8(%arg0: i32, %arg1: i32) -> (i32, i32) {
    %c0_i32 = arith.constant 0 : i32
    %c0_i32_0 = arith.constant 0 : i32
    %c0_i32_1 = arith.constant 0 : i32
    return %c0_i32, %c0_i32_0 : i32, i32
  }
  func.func @transform_9(%arg0: i32, %arg1: i32) -> (i32, i32) {
    %c0_i32 = arith.constant 0 : i32
    %c0_i32_0 = arith.constant 0 : i32
    return %arg0, %c0_i32 : i32, i32
  }
  func.func @transform_10(%arg0: i32, %arg1: i32) -> (i32, i32) {
    %c0_i32 = arith.constant 0 : i32
    %c0_i32_0 = arith.constant 0 : i32
    return %arg0, %c0_i32 : i32, i32
  }
  func.func @transform_11(%arg0: i32, %arg1: i32) -> (i32, i32, i32) {
    %c0_i32 = arith.constant 0 : i32
    %c0_i32_0 = arith.constant 0 : i32
    %c0_i32_1 = arith.constant 0 : i32
    return %c0_i32, %arg0, %c0_i32_0 : i32, i32, i32
  }
}

</mosaic_0001>

<bundles_post_ra>
// kernel: tpu_custom_call.1
= control target key start
LH: loop header
LB: loop body
LE: loop exit
PB: predicated region body
PF: predicated region fallthrough
CT: control target
= control target key end

     0   :  { %s1059_s0 = inlined_call_operand.vmem [shape: f32[8,8,128], index: 0, kind: input, shape index: {}]   ;;  %s1060_s1 = inlined_call_operand.hbm [shape: f32[8,8,128], index: 1, kind: input, shape index: {}]   ;;  %s1061_s2 = inlined_call_operand.vmem [shape: f32[8,8,1], index: 2, kind: input, shape index: {}]   ;;  %s1062_s3 = inlined_call_operand.hbm [shape: f32[256,256], index: 3, kind: input, shape index: {}]   ;;  %s1063_s4 = inlined_call_operand.vmem [shape: f32[1,256], index: 4, kind: input, shape index: {}]   ;;  %s1064_s5 = inlined_call_operand.hbm [shape: f32[128,128], index: 5, kind: input, shape index: {}]   ;;  %s1065_s6 = inlined_call_operand.vmem [shape: f32[1,128], index: 6, kind: input, shape index: {}]   ;;  %s1066_s7 = inlined_call_operand.vmem [shape: f32[1,128], index: 7, kind: input, shape index: {}]   ;;  %s1067_s8 = inlined_call_operand.<no memory space> [shape: f32[1,1], index: 8, kind: input, shape index: {}]   ;;  %s1068_s9 = inlined_call_operand.hbm [shape: f32[8,128], index: 9, kind: output, shape index: {0}]   ;;  %s1069_s10 = inlined_call_operand.hbm [shape: f32[8,128], index: 10, kind: output, shape index: {1}]   ;;  %s1070_s11 = inlined_call_operand.hbm [shape: f32[2,8,128], index: 11, kind: output, shape index: {2}]  }
   0x1   :  { %v17_v0 = vstv %s1067_s8 }
   0x2   :  { %18 = vst [vmem:[#allocation4] sm:$0x1] %v17_v0 }
   0x3   :  { %19 = vsyncpa [#allocation6], 0 }
   0x4   :  { %20 = vsyncpa [#allocation9], 0 }
   0x5   :  { %21 = vsyncpa [#allocation7], 0 }
   0x6   :  { %22 = vsyncpa [#allocation13], 0  ;;  %s847_s19 = smov [#allocation8]   ;;  %s707_s23 = scalar_lea.hbm %s1062_s3, 8192 }
   0x7   :  { %s44_s20 = sshll.u32 %s847_s19, 4  ;;  %p708_p0 = scmp.ne.s32.totalorder %s1062_s3, %s707_s23  ;;  %s45_s20 = int_to_ptr.vmem [resolvable:$true] %s44_s20 }
   0x8   :  { %p711_p1 = scmp.lt.u32.totalorder %s707_s23, %s1062_s3 }
   0xa   :  { %p713_p2 = pnand %p711_p1, %p708_p0 }
   0xc   :  { %716 = shalt.err (!%p713_p2)
}
   0xd   :  { %s717_s8 = scalar_lea.vmem %s45_s20, 8192  ;;  %p722_p4 = scmp.lt.s32.totalorder %s45_s20, %s45_s20 }
   0xe   :  { %p718_p3 = scmp.ne.s32.totalorder %s45_s20, %s717_s8  ;;  %p723_p5 = scmp.lt.s32.totalorder %s717_s8, %s717_s8 }
  0x10   :  { %p724_p6 = por %p723_p5, %p722_p4 }
  0x12   :  { %p725_p7 = pnand %p724_p6, %p718_p3 }
  0x14   :  { %728 = shalt.err (!%p725_p7)
}
  0x15   :  { %s848_s28 = smov 256   ;;  %s849_s29 = smov 16  }
  0x16   :  { %50 = dma.hbm_to_vmem [thread:$0]  %s1062_s3, 8192, %s45_s20, [#allocation9], %s848_s28, %s848_s28, %s849_s29  }
  0x17   :  { %s850_s13 = smov [#allocation5]   ;;  %s729_s17 = scalar_lea.hbm %s1060_s1, 1024 }
  0x18   :  { %s30_s14 = sshll.u32 %s850_s13, 4  ;;  %p730_p8 = scmp.ne.s32.totalorder %s1060_s1, %s729_s17  ;;  %s31_s14 = int_to_ptr.vmem [resolvable:$true] %s30_s14 }
  0x19   :  { %p733_p9 = scmp.lt.u32.totalorder %s729_s17, %s1060_s1 }
  0x1b   :  { %p735_p10 = pnand %p733_p9, %p730_p8 }
  0x1d   :  { %738 = shalt.err (!%p735_p10)
}
  0x1e   :  { %s739_s23 = scalar_lea.vmem %s31_s14, 1024  ;;  %p744_p12 = scmp.lt.s32.totalorder %s31_s14, %s31_s14 }
  0x1f   :  { %p740_p11 = scmp.ne.s32.totalorder %s31_s14, %s739_s23  ;;  %p745_p13 = scmp.lt.s32.totalorder %s739_s23, %s739_s23 }
  0x21   :  { %p746_p0 = por %p745_p13, %p744_p12 }
  0x23   :  { %p747_p1 = pnand %p746_p0, %p740_p11 }
  0x25   :  { %750 = shalt.err (!%p747_p1)
}
  0x26   :  { %s851_s3 = smov 128   ;;  %s852_s20 = smov 8  }
  0x27   :  { %36 = dma.hbm_to_vmem [thread:$0]  %s1060_s1, 1024, %s31_s14, [#allocation6], %s851_s3, %s851_s3, %s852_s20  }
  0x28   :  { %s853_s26 = smov [#allocation10]   ;;  %s751_s29 = scalar_lea.hbm %s1064_s5, 2048 }
  0x29   :  { %s58_s27 = sshll.u32 %s853_s26, 4  ;;  %p752_p2 = scmp.ne.s32.totalorder %s1064_s5, %s751_s29  ;;  %s59_s27 = int_to_ptr.vmem [resolvable:$true] %s58_s27 }
  0x2a   :  { %p755_p3 = scmp.lt.u32.totalorder %s751_s29, %s1064_s5 }
  0x2c   :  { %p757_p4 = pnand %p755_p3, %p752_p2 }
  0x2e   :  { %760 = shalt.err (!%p757_p4)
}
  0x2f   :  { %s761_s16 = scalar_lea.vmem %s59_s27, 2048  ;;  %p766_p6 = scmp.lt.s32.totalorder %s59_s27, %s59_s27 }
  0x30   :  { %p762_p5 = scmp.ne.s32.totalorder %s59_s27, %s761_s16  ;;  %p767_p7 = scmp.lt.s32.totalorder %s761_s16, %s761_s16 }
  0x32   :  { %p768_p8 = por %p767_p7, %p766_p6 }
  0x34   :  { %p769_p9 = pnand %p768_p8, %p762_p5 }
  0x36   :  { %772 = shalt.err (!%p769_p9)
}
  0x37   :  { %64 = dma.hbm_to_vmem [thread:$0]  %s1064_s5, 2048, %s59_s27, [#allocation9], %s851_s3, %s851_s3, %s852_s20  }
  0x38   :  { %839 = dma.done.wait [#allocation6], 1024  }
  0x39   :  { %840 = vsyncadd [#allocation6], 4294966272 }
  0x3a   :  { %841 = dma.done.wait [#allocation9], 10240  }
  0x3b   :  { %842 = vsyncadd [#allocation9], 4294957056  ;;  %v854_v1 = vmov 0   ;;  %v88_v2 = vld [vmem:[%s1061_s2 + $0x10] sm:$0xff]  ;;  %v86_v3 = vld [vmem:[%s1061_s2] sm:$0xff]  ;;  %s856_s30 = smov [#allocation11]  }
  0x3c   :  { %698 = vset.pattern.permute.xlu1 %v854_v1  ;;  %697 = vset.pattern.permute.xlu0 %v854_v1  ;;  %v89_v4 = vld [vmem:[%s1061_s2 + $0x18] sm:$0xff]  ;;  %v87_v5 = vld [vmem:[%s1061_s2 + $0x8] sm:$0xff]  ;;  %v90_v20 = vld [vmem:[%s1061_s2 + $0x20] sm:$0xff]  ;;  %s493_s12 = sshll.u32 %s856_s30, 4  ;;  %s494_s12 = int_to_ptr.vmem [resolvable:$true] %s493_s12 }
  0x3d   :  { %115 = vperm.xlu1 %698, %v88_v2   ;;  %105 = vperm.xlu0 %697, %v86_v3   ;;  %v192_v6 = vld [vmem:[#allocation8 + $0x8] sm:$0xff]  ;;  %v194_v7 = vld [vmem:[#allocation8 + $0x18] sm:$0xff]  ;;  %v191_v8 = vld [vmem:[#allocation8] sm:$0xff] }
  0x3e   :  { %v193_v9 = vld [vmem:[#allocation8 + $0x10] sm:$0xff]  ;;  %v590_v10 = vpack.c.bf16 %v194_v7, %v192_v6  ;;  %v196_v12 = vld [vmem:[#allocation8 + $0x28] sm:$0xff]  ;;  %v198_v13 = vld [vmem:[#allocation8 + $0x38] sm:$0xff] }
  0x3f   :  { %v592_v11 = vpack.c.bf16 %v193_v9, %v191_v8  ;;  %v195_v14 = vld [vmem:[#allocation8 + $0x20] sm:$0xff]  ;;  %v594_v15 = vpack.c.bf16 %v198_v13, %v196_v12  ;;  %v197_v16 = vld [vmem:[#allocation8 + $0x30] sm:$0xff]  ;;  %v200_v17 = vld [vmem:[#allocation8 + $0x48] sm:$0xff] }
  0x40   :  { %v202_v18 = vld [vmem:[#allocation8 + $0x58] sm:$0xff]  ;;  %v91_v19 = vld [vmem:[%s1061_s2 + $0x28] sm:$0xff]  ;;  %591 = vmatprep.subr.bf16.mxu0 %v590_v10  ;;  %v596_v21 = vpack.c.bf16 %v197_v16, %v195_v14  ;;  %v201_v24 = vld [vmem:[#allocation8 + $0x50] sm:$0xff] }
  0x41   :  { %120 = vperm.xlu1 %698, %v89_v4   ;;  %110 = vperm.xlu0 %697, %v87_v5   ;;  %v598_v22 = vpack.c.bf16 %v202_v18, %v200_v17  ;;  %v199_v23 = vld [vmem:[#allocation8 + $0x40] sm:$0xff]  ;;  %v204_v25 = vld [vmem:[#allocation8 + $0x68] sm:$0xff]  ;;  %v206_v26 = vld [vmem:[#allocation8 + $0x78] sm:$0xff] }
  0x42   :  { %593 = vmatpush1.bf16.msra.mxu0 %v592_v11  ;;  %v93_v27 = vld [vmem:[%s1061_s2 + $0x38] sm:$0xff]  ;;  %v92_v28 = vld [vmem:[%s1061_s2 + $0x30] sm:$0xff]  ;;  %v600_v29 = vpack.c.bf16 %v201_v24, %v199_v23  ;;  %v602_v30 = vpack.c.bf16 %v206_v26, %v204_v25  ;;  %v203_v31 = vld [vmem:[#allocation8 + $0x60] sm:$0xff] }
  0x43   :  { %595 = vmatprep.subr.bf16.mxu0 %v594_v15  ;;  %v205_v32 = vld [vmem:[#allocation8 + $0x70] sm:$0xff]  ;;  %v208_v33 = vld [vmem:[#allocation8 + $0x88] sm:$0xff]  ;;  %v210_v34 = vld [vmem:[#allocation8 + $0x98] sm:$0xff] }
  0x44   :  { %v604_v35 = vpack.c.bf16 %v205_v32, %v203_v31  ;;  %v606_v36 = vpack.c.bf16 %v210_v34, %v208_v33  ;;  %v207_v37 = vld [vmem:[#allocation8 + $0x80] sm:$0xff]  ;;  %v209_v38 = vld [vmem:[#allocation8 + $0x90] sm:$0xff]  ;;  %v212_v39 = vld [vmem:[#allocation8 + $0xa8] sm:$0xff] }
  0x45   :  { %130 = vperm.xlu1 %698, %v91_v19   ;;  %125 = vperm.xlu0 %697, %v90_v20   ;;  %v214_v40 = vld [vmem:[#allocation8 + $0xb8] sm:$0xff]  ;;  %v608_v41 = vpack.c.bf16 %v209_v38, %v207_v37  ;;  %v211_v43 = vld [vmem:[#allocation8 + $0xa0] sm:$0xff]  ;;  %v213_v44 = vld [vmem:[#allocation8 + $0xb0] sm:$0xff] }
  0x46   :  { %597 = vmatpush1.bf16.msra.mxu0 %v596_v21  ;;  %v610_v42 = vpack.c.bf16 %v214_v40, %v212_v39  ;;  %v216_v45 = vld [vmem:[#allocation8 + $0xc8] sm:$0xff]  ;;  %v218_v46 = vld [vmem:[#allocation8 + $0xd8] sm:$0xff]  ;;  %v612_v47 = vpack.c.bf16 %v213_v44, %v211_v43  ;;  %v215_v49 = vld [vmem:[#allocation8 + $0xc0] sm:$0xff] }
  0x47   :  { %599 = vmatprep.subr.bf16.mxu0 %v598_v22  ;;  %v614_v48 = vpack.c.bf16 %v218_v46, %v216_v45  ;;  %v217_v50 = vld [vmem:[#allocation8 + $0xd0] sm:$0xff]  ;;  %v220_v51 = vld [vmem:[#allocation8 + $0xe8] sm:$0xff]  ;;  %v222_v52 = vld [vmem:[#allocation8 + $0xf8] sm:$0xff] }
  0x48   :  { %v616_v53 = vpack.c.bf16 %v217_v50, %v215_v49  ;;  %v618_v54 = vpack.c.bf16 %v222_v52, %v220_v51  ;;  %v219_v55 = vld [vmem:[#allocation8 + $0xe0] sm:$0xff]  ;;  %v221_v56 = vld [vmem:[#allocation8 + $0xf0] sm:$0xff]  ;;  %v224_v57 = vld [vmem:[#allocation8 + $0x108] sm:$0xff] }
  0x49   :  { %140 = vperm.xlu1 %698, %v93_v27   ;;  %135 = vperm.xlu0 %697, %v92_v28   ;;  %v226_v58 = vld [vmem:[#allocation8 + $0x118] sm:$0xff]  ;;  %v340_v59 = vld [vmem:[#allocation10] sm:$0xff]  ;;  %v341_v60 = vld [vmem:[#allocation10 + $0x8] sm:$0xff]  ;;  %v620_v0 = vpack.c.bf16 %v221_v56, %v219_v55 }
  0x4a   :  { %601 = vmatpush1.bf16.msra.mxu0 %v600_v29  ;;  %v654_v61 = vpack.c.bf16 %v341_v60, %v340_v59  ;;  %v342_v62 = vld [vmem:[#allocation10 + $0x10] sm:$0xff]  ;;  %v343_v63 = vld [vmem:[#allocation10 + $0x18] sm:$0xff]  ;;  %v344_v2 = vld [vmem:[#allocation10 + $0x20] sm:$0xff]  ;;  %v622_v4 = vpack.c.bf16 %v226_v58, %v224_v57 }
  0x4b   :  { %603 = vmatprep.subr.bf16.mxu0 %v602_v30  ;;  %v658_v1 = vpack.c.bf16 %v343_v63, %v342_v62  ;;  %v345_v3 = vld [vmem:[#allocation10 + $0x28] sm:$0xff]  ;;  %v223_v5 = vld [vmem:[#allocation8 + $0x100] sm:$0xff]  ;;  %v225_v6 = vld [vmem:[#allocation8 + $0x110] sm:$0xff] }
  0x4c   :  { %655 = vmatprep.subr.bf16.mxu1 %v654_v61  ;;  %v228_v7 = vld [vmem:[#allocation8 + $0x128] sm:$0xff]  ;;  %v230_v8 = vld [vmem:[#allocation8 + $0x138] sm:$0xff]  ;;  %v662_v9 = vpack.c.bf16 %v345_v3, %v344_v2  ;;  %v624_v10 = vpack.c.bf16 %v225_v6, %v223_v5  ;;  %v346_v11 = vld [vmem:[#allocation10 + $0x30] sm:$0xff] }
  0x4d   :  { %657 = vmatpush3.bf16.msra.mxu1 %v654_v61  ;;  %v347_v12 = vld [vmem:[#allocation10 + $0x38] sm:$0xff]  ;;  %v626_v13 = vpack.c.bf16 %v230_v8, %v228_v7  ;;  %v227_v14 = vld [vmem:[#allocation8 + $0x120] sm:$0xff]  ;;  %v229_v15 = vld [vmem:[#allocation8 + $0x130] sm:$0xff] }
  0x4e   :  { %605 = vmatpush1.bf16.msra.mxu0 %v604_v35  ;;  %659 = vmatprep.subr.bf16.mxu1 %v658_v1  ;;  %v232_v16 = vld [vmem:[#allocation8 + $0x148] sm:$0xff]  ;;  %v234_v17 = vld [vmem:[#allocation8 + $0x158] sm:$0xff]  ;;  %v666_v18 = vpack.c.bf16 %v347_v12, %v346_v11  ;;  %v628_v19 = vpack.c.bf16 %v229_v15, %v227_v14  ;;  %v348_v20 = vld [vmem:[#allocation10 + $0x40] sm:$0xff] }
  0x4f   :  { %607 = vmatprep.subr.bf16.mxu0 %v606_v36  ;;  %v349_v21 = vld [vmem:[#allocation10 + $0x48] sm:$0xff]  ;;  %v630_v22 = vpack.c.bf16 %v234_v17, %v232_v16  ;;  %v231_v23 = vld [vmem:[#allocation8 + $0x140] sm:$0xff]  ;;  %v233_v24 = vld [vmem:[#allocation8 + $0x150] sm:$0xff] }
  0x50   :  { %v236_v25 = vld [vmem:[#allocation8 + $0x168] sm:$0xff]  ;;  %v238_v26 = vld [vmem:[#allocation8 + $0x178] sm:$0xff]  ;;  %v670_v27 = vpack.c.bf16 %v349_v21, %v348_v20  ;;  %v632_v28 = vpack.c.bf16 %v233_v24, %v231_v23  ;;  %v350_v29 = vld [vmem:[#allocation10 + $0x50] sm:$0xff] }
  0x51   :  { %661 = vmatpush3.bf16.msra.mxu1 %v658_v1  ;;  %v351_v30 = vld [vmem:[#allocation10 + $0x58] sm:$0xff]  ;;  %v634_v31 = vpack.c.bf16 %v238_v26, %v236_v25  ;;  %v235_v32 = vld [vmem:[#allocation8 + $0x160] sm:$0xff]  ;;  %v237_v33 = vld [vmem:[#allocation8 + $0x170] sm:$0xff] }
  0x52   :  { %609 = vmatpush1.bf16.msra.mxu0 %v608_v41  ;;  %663 = vmatprep.subr.bf16.mxu1 %v662_v9  ;;  %v240_v34 = vld [vmem:[#allocation8 + $0x188] sm:$0xff]  ;;  %v242_v35 = vld [vmem:[#allocation8 + $0x198] sm:$0xff]  ;;  %v674_v36 = vpack.c.bf16 %v351_v30, %v350_v29  ;;  %v636_v37 = vpack.c.bf16 %v237_v33, %v235_v32  ;;  %v352_v38 = vld [vmem:[#allocation10 + $0x60] sm:$0xff] }
  0x53   :  { %611 = vmatprep.subr.bf16.mxu0 %v610_v42  ;;  %v353_v39 = vld [vmem:[#allocation10 + $0x68] sm:$0xff]  ;;  %v638_v40 = vpack.c.bf16 %v242_v35, %v240_v34  ;;  %v239_v41 = vld [vmem:[#allocation8 + $0x180] sm:$0xff]  ;;  %v241_v42 = vld [vmem:[#allocation8 + $0x190] sm:$0xff] }
  0x54   :  { %v244_v43 = vld [vmem:[#allocation8 + $0x1a8] sm:$0xff]  ;;  %v246_v44 = vld [vmem:[#allocation8 + $0x1b8] sm:$0xff]  ;;  %v678_v45 = vpack.c.bf16 %v353_v39, %v352_v38  ;;  %v640_v46 = vpack.c.bf16 %v241_v42, %v239_v41  ;;  %v245_v49 = vld [vmem:[#allocation8 + $0x1b0] sm:$0xff] }
  0x55   :  { %665 = vmatpush3.bf16.msra.mxu1 %v662_v9  ;;  %v248_v50 = vld [vmem:[#allocation8 + $0x1c8] sm:$0xff]  ;;  %v250_v51 = vld [vmem:[#allocation8 + $0x1d8] sm:$0xff]  ;;  %v249_v55 = vld [vmem:[#allocation8 + $0x1d0] sm:$0xff] }
  0x56   :  { %613 = vmatpush1.bf16.msra.mxu0 %v612_v47  ;;  %667 = vmatprep.subr.bf16.mxu1 %v666_v18  ;;  %v642_v47 = vpack.c.bf16 %v246_v44, %v244_v43  ;;  %v252_v56 = vld [vmem:[#allocation8 + $0x1e8] sm:$0xff]  ;;  %v254_v57 = vld [vmem:[#allocation8 + $0x1f8] sm:$0xff]  ;;  %v251_v60 = vld [vmem:[#allocation8 + $0x1e0] sm:$0xff] }
  0x57   :  { %615 = vmatprep.subr.bf16.mxu0 %v614_v48  ;;  %v243_v48 = vld [vmem:[#allocation8 + $0x1a0] sm:$0xff]  ;;  %v650_v59 = vpack.c.bf16 %v254_v57, %v252_v56  ;;  %v253_v61 = vld [vmem:[#allocation8 + $0x1f0] sm:$0xff]  ;;  %v164_v14 = vld [vmem:[#allocation5 + $0x18] sm:$0xff]  ;;  %v257_v56 = vlaneseq }
  0x58   :  { %v644_v52 = vpack.c.bf16 %v245_v49, %v243_v48  ;;  %v652_v62 = vpack.c.bf16 %v253_v61, %v251_v60  ;;  %v95_v1 = vld [vmem:[%s1059_s0] sm:$0xff]  ;;  %v96_v3 = vld [vmem:[%s1059_s0 + $0x8] sm:$0xff]  ;;  %v97_v5 = vld [vmem:[%s1059_s0 + $0x10] sm:$0xff] }
  0x59   :  { %669 = vmatpush3.bf16.msra.mxu1 %v666_v18  ;;  %v161_v2 = vld [vmem:[#allocation5] sm:$0xff]  ;;  %v163_v6 = vld [vmem:[#allocation5 + $0x10] sm:$0xff]  ;;  %v168_v41 = vld [vmem:[#allocation5 + $0x38] sm:$0xff]  ;;  %v258_v57 = vshrl.u32 %v257_v56, 7 }
  0x5a   :  { %617 = vmatpush1.bf16.msra.mxu0 %v616_v53  ;;  %671 = vmatprep.subr.bf16.mxu1 %v670_v27  ;;  %v646_v53 = vpack.c.bf16 %v250_v51, %v248_v50  ;;  %v99_v20 = vld [vmem:[%s1059_s0 + $0x20] sm:$0xff]  ;;  %v101_v33 = vld [vmem:[%s1059_s0 + $0x30] sm:$0xff] }
  0x5b   :  { %619 = vmatprep.subr.bf16.mxu0 %v618_v54  ;;  %v247_v54 = vld [vmem:[#allocation8 + $0x1c0] sm:$0xff]  ;;  %v167_v34 = vld [vmem:[#allocation5 + $0x30] sm:$0xff]  ;;  %v263_v60 = vsub.s32 1, %v258_v57 }
  0x5c   :  { %v648_v58 = vpack.c.bf16 %v249_v55, %v247_v54  ;;  %v165_v21 = vld [vmem:[#allocation5 + $0x20] sm:$0xff]  ;;  %v355_v54 = vld [vmem:[#allocation10 + $0x78] sm:$0xff] }
  0x5d   :  { %673 = vmatpush3.bf16.msra.mxu1 %v670_v27  ;;  %v100_v27 = vld [vmem:[%s1059_s0 + $0x28] sm:$0xff] }
  0x5e   :  { %621 = vmatpush1.bf16.msra.mxu0 %v620_v0  ;;  %675 = vmatprep.subr.bf16.mxu1 %v674_v36 }
  0x5f   :  { %623 = vmatprep.subr.bf16.mxu0 %v622_v4  ;;  %v162_v4 = vld [vmem:[#allocation5 + $0x8] sm:$0xff] }
  0x61   :  { %677 = vmatpush3.bf16.msra.mxu1 %v674_v36 }
  0x62   :  { %625 = vmatpush1.bf16.msra.mxu0 %v624_v10  ;;  %679 = vmatprep.subr.bf16.mxu1 %v678_v45 }
  0x63   :  { %627 = vmatprep.subr.bf16.mxu0 %v626_v13  ;;  %v98_v13 = vld [vmem:[%s1059_s0 + $0x18] sm:$0xff] }
  0x65   :  { %681 = vmatpush3.bf16.msra.mxu1 %v678_v45 }
  0x66   :  { %629 = vmatpush1.bf16.msra.mxu0 %v628_v19 }
  0x67   :  { %631 = vmatprep.subr.bf16.mxu0 %v630_v22 }
  0x6a   :  { %633 = vmatpush1.bf16.msra.mxu0 %v632_v28  ;;  %v166_v28 = vld [vmem:[#allocation5 + $0x28] sm:$0xff] }
  0x6b   :  { %635 = vmatprep.subr.bf16.mxu0 %v634_v31 }
  0x6e   :  { %637 = vmatpush1.bf16.msra.mxu0 %v636_v37 }
  0x6f   :  { %639 = vmatprep.subr.bf16.mxu0 %v638_v40  ;;  %v102_v40 = vld [vmem:[%s1059_s0 + $0x38] sm:$0xff] }
  0x72   :  { %641 = vmatpush1.bf16.msra.mxu0 %v640_v46 }
  0x73   :  { %643 = vmatprep.subr.bf16.mxu0 %v642_v47 }
  0x76   :  { %645 = vmatpush1.bf16.msra.mxu0 %v644_v52 }
  0x77   :  { %647 = vmatprep.subr.bf16.mxu0 %v646_v53  ;;  %v354_v53 = vld [vmem:[#allocation10 + $0x70] sm:$0xff] }
  0x78   :  { %v682_v55 = vpack.c.bf16 %v355_v54, %v354_v53 }
  0x7a   :  { %649 = vmatpush1.bf16.msra.mxu0 %v648_v58  ;;  %683 = vmatprep.subr.bf16.mxu1 %v682_v55  ;;  %v259_v58 = vsub.s32 0, %v258_v57 }
  0x7b   :  { %651 = vmatprep.subr.bf16.mxu0 %v650_v59  ;;  %685 = vmatpush3.bf16.msra.mxu1 %v682_v55  ;;  %v255_v59 = vld [vmem:[%s1063_s4] sm:$0x3] }
  0x7c   :  { %v260_v61 = vrot.slane %v255_v59, %v259_v58 }
  0x7e   :  { %653 = vmatpush1.bf16.msra.mxu0 %v652_v62  ;;  %v264_v62 = vrot.slane %v255_v59, %v263_v60 }
  0xbc   :  { %v116_v63 = vpop.permute.xlu1 %115  ;;  %v106_v0 = vpop.permute.xlu0 %105 }
  0xbd   :  { %v143_v9 = vmul.f32 %v106_v0, %v95_v1  ;;  %v169_v10 = vmul.f32 %v161_v2, %v106_v0  ;;  %v145_v15 = vmul.f32 %v116_v63, %v97_v5  ;;  %v171_v16 = vmul.f32 %v163_v6, %v116_v63 }
  0xc0   :  { %v121_v7 = vpop.permute.xlu1 %120  ;;  %v111_v8 = vpop.permute.xlu0 %110 }
  0xc1   :  { %v144_v11 = vmul.f32 %v111_v8, %v96_v3  ;;  %v170_v12 = vmul.f32 %v162_v4, %v111_v8  ;;  %v146_v23 = vmul.f32 %v121_v7, %v98_v13  ;;  %v172_v24 = vmul.f32 %v164_v14, %v121_v7  ;;  %v532_v3 = vld [vmem:[%s1065_s6] ss:$0 sm:$0xff]  ;;  %s855_s6 = smov [#allocation12]  }
  0xc2   :  { %v533_v8 = vld [vmem:[%s1066_s7] ss:$0 sm:$0xff]  ;;  %s503_s7 = sshll.u32 %s855_s6, 4  ;;  %s504_s7 = int_to_ptr.vmem [resolvable:$true] %s503_s7 }
  0xc3   :  { %v151_v17 = vadd.f32 %v144_v11, %v143_v9  ;;  %v177_v18 = vadd.f32 %v170_v12, %v169_v10  ;;  %v534_v13 = vld [vmem:[#allocation4] ss:$0 sm:$0xff]  ;;  %s773_s2 = scalar_lea.vmem %s504_s7, 128  ;;  %p778_p11 = scmp.lt.s32.totalorder %s504_s7, %s504_s7 }
  0xc4   :  { %v131_v19 = vpop.permute.xlu1 %130  ;;  %v126_v22 = vpop.permute.xlu0 %125  ;;  %p774_p10 = scmp.ne.s32.totalorder %s504_s7, %s773_s2  ;;  %p779_p12 = scmp.lt.s32.totalorder %s773_s2, %s773_s2 }
  0xc5   :  { %v152_v25 = vadd.f32 %v151_v17, %v145_v15  ;;  %v178_v26 = vadd.f32 %v177_v18, %v171_v16  ;;  %v147_v31 = vmul.f32 %v126_v22, %v99_v20  ;;  %v173_v32 = vmul.f32 %v165_v21, %v126_v22 }
  0xc6   :  { %v148_v36 = vmul.f32 %v131_v19, %v100_v27  ;;  %v174_v37 = vmul.f32 %v166_v28, %v131_v19  ;;  %p780_p13 = por %p779_p12, %p778_p11 }
  0xc7   :  { %v153_v29 = vadd.f32 %v152_v25, %v146_v23  ;;  %v179_v30 = vadd.f32 %v178_v26, %v172_v24 }
  0xc8   :  { %v136_v35 = vpop.permute.xlu0 %135  ;;  %v141_v42 = vpop.permute.xlu1 %140  ;;  %p781_p0 = pnand %p780_p13, %p774_p10 }
  0xc9   :  { %v154_v38 = vadd.f32 %v153_v29, %v147_v31  ;;  %v180_v39 = vadd.f32 %v179_v30, %v173_v32  ;;  %v149_v44 = vmul.f32 %v136_v35, %v101_v33  ;;  %v175_v45 = vmul.f32 %v167_v34, %v136_v35 }
  0xca   :  { %v150_v47 = vmul.f32 %v141_v42, %v102_v40  ;;  %v176_v48 = vmul.f32 %v168_v41, %v141_v42 }
  0xcb   :  { %v155_v43 = vadd.f32 %v154_v38, %v148_v36  ;;  %v181_v46 = vadd.f32 %v180_v39, %v174_v37 }
  0xcd   :  { %v156_v49 = vadd.f32 %v155_v43, %v149_v44  ;;  %v182_v50 = vadd.f32 %v181_v46, %v175_v45 }
  0xcf   :  { %v183_v51 = vadd.f32 %v182_v50, %v176_v48  ;;  %v157_v52 = vadd.f32 %v156_v49, %v150_v47 }
  0xd1   :  { %331 = vmatprep.mubr.f32.mxu0 %v183_v51 }
  0xd2   :  { %332 = vmatmul.mubr.f32.vlgmr.msra.gmra.mrb[0].mxu0 %v157_v52 }
 0x1a5   :  { %v333_v63 = vpop.f32.mrb[0].mxu0 }
 0x1a6   :  { %v334_v0 = vadd.f32 %v333_v63, %v260_v61  ;;  %v335_v1 = vpop.f32.mrb[1].mxu0 }
 0x1a7   :  { %v336_v2 = vadd.f32 %v335_v1, %v264_v62 }
 0x1a8   :  { %338 = vst [vmem:[#allocation11] sm:$0xff] %v334_v0  ;;  %587 = vmatprep.mubr.f32.mxu1 %v334_v0 }
 0x1a9   :  { %339 = vst [vmem:[#allocation12] sm:$0xff] %v336_v2  ;;  %588 = vmatmul.mubr.f32.vlgmr.msra.gmra.mrb[0].mxu1 %v336_v2 }
 0x27c   :  { %v589_v4 = vpop.f32.mrb[0].mxu1 }
 0x27d   :  { %v435_v5 = vadd.f32 %v589_v4, %v532_v3  ;;  %v429_v6 = vpop.f32.mrb[1].mxu1 }
 0x27e   :  { %v430_v7 = vadd.f32 %v532_v3, %v429_v6 }
 0x27f   :  { %v439_v9 = vmax.f32 %v435_v5, 0.0 }
 0x280   :  { %v438_v10 = vmax.f32 %v430_v7, 0.0 }
 0x281   :  { %v448_v11 = vmul.f32 %v533_v8, %v439_v9 }
 0x282   :  { %v447_v12 = vmul.f32 %v533_v8, %v438_v10 }
 0x283   :  { %451 = vadd.xlane.f32.xlu1 %v448_v11 }
 0x284   :  { %449 = vadd.xlane.f32.xlu0 %v447_v12 }
 0x310   :  { %v452_v14 = vpop.xlane.xlu1 %451 }
 0x311   :  { %v461_v15 = vadd.f32 %v534_v13, %v452_v14  ;;  %v450_v16 = vpop.xlane.xlu0 %449 }
 0x312   :  { %v460_v17 = vadd.f32 %v534_v13, %v450_v16 }
 0x313   :  { %v536_v18 = vmul.f32 -1.442695, %v461_v15 }
 0x314   :  { %v535_v19 = vmul.f32 -1.442695, %v460_v17 }
 0x315   :  { %699 = vpow2.f32 %v536_v18 }
 0x316   :  { %701 = vpow2.f32 %v535_v19 }
 0x31f   :  { %v700_v20 = vpop.eup %699 }
 0x320   :  { %v702_v21 = vpop.eup %701  ;;  %v469_v22 = vadd.f32 1.0, %v700_v20 }
 0x321   :  { %v468_v23 = vadd.f32 1.0, %v702_v21 }
 0x322   :  { %703 = vrcp.f32 %v469_v22 }
 0x323   :  { %705 = vrcp.f32 %v468_v23 }
 0x32c   :  { %v704_v24 = vpop.eup %703 }
 0x32d   :  { %v706_v25 = vpop.eup %705  ;;  %482 = vperm.xlu1 %698, %v704_v24  }
 0x32e   :  { %476 = vperm.xlu0 %697, %v706_v25  }
 0x32f   :  { %784 = shalt.err (!%p781_p0)
}
 0x330   :  { %s785_s16 = scalar_lea.hbm %s1069_s10, 128 }
 0x331   :  { %p786_p1 = scmp.ne.s32.totalorder %s1069_s10, %s785_s16  ;;  %p789_p2 = scmp.lt.u32.totalorder %s785_s16, %s1069_s10 }
 0x333   :  { %p791_p3 = pnand %p789_p2, %p786_p1 }
 0x335   :  { %794 = shalt.err (!%p791_p3)
}
 0x336   :  { %506 = dma.vmem_to_hbm [thread:$0]  %s504_s7, 128, %s1069_s10, [#allocation13]  }
 0x337   :  { %s795_s22 = scalar_lea.vmem %s494_s12, 128  ;;  %p800_p5 = scmp.lt.s32.totalorder %s494_s12, %s494_s12 }
 0x338   :  { %p796_p4 = scmp.ne.s32.totalorder %s494_s12, %s795_s22  ;;  %p801_p6 = scmp.lt.s32.totalorder %s795_s22, %s795_s22 }
 0x33a   :  { %p802_p7 = por %p801_p6, %p800_p5 }
 0x33c   :  { %p803_p8 = pnand %p802_p7, %p796_p4 }
 0x33e   :  { %806 = shalt.err (!%p803_p8)
}
 0x33f   :  { %s807_s24 = scalar_lea.hbm %s1068_s9, 128 }
 0x340   :  { %p808_p9 = scmp.ne.s32.totalorder %s1068_s9, %s807_s24  ;;  %p811_p10 = scmp.lt.u32.totalorder %s807_s24, %s1068_s9 }
 0x342   :  { %p813_p11 = pnand %p811_p10, %p808_p9 }
 0x344   :  { %816 = shalt.err (!%p813_p11)
}
 0x345   :  { %496 = dma.vmem_to_hbm [thread:$0]  %s494_s12, 128, %s1068_s9, [#allocation7]  }
 0x346   :  { %s857_s28 = smov [#allocation14]  }
 0x347   :  { %s512_s4 = sshll.u32 %s857_s28, 4  ;;  %s513_s4 = int_to_ptr.vmem [resolvable:$true] %s512_s4 }
 0x348   :  { %s817_s29 = scalar_lea.vmem %s513_s4, 256  ;;  %p822_p13 = scmp.lt.s32.totalorder %s513_s4, %s513_s4 }
 0x349   :  { %p818_p12 = scmp.ne.s32.totalorder %s513_s4, %s817_s29  ;;  %p823_p0 = scmp.lt.s32.totalorder %s817_s29, %s817_s29 }
 0x34b   :  { %p824_p1 = por %p823_p0, %p822_p13 }
 0x34d   :  { %p825_p2 = pnand %p824_p1, %p818_p12 }
 0x3ac   :  { %v483_v26 = vpop.permute.xlu1 %482 }
 0x3ad   :  { %486 = vst [vmem:[#allocation14 + $0x8] sm:$0xff] %v483_v26  ;;  %v477_v27 = vpop.permute.xlu0 %476 }
 0x3ae   :  { %479 = vst [vmem:[#allocation14] sm:$0xff] %v477_v27 }
 0x3af   :  { %828 = shalt.err (!%p825_p2)
}
 0x3b0   :  { %s829_s30 = scalar_lea.hbm %s1070_s11, 256 }
 0x3b1   :  { %p830_p3 = scmp.ne.s32.totalorder %s1070_s11, %s829_s30  ;;  %p833_p4 = scmp.lt.u32.totalorder %s829_s30, %s1070_s11 }
 0x3b3   :  { %p835_p5 = pnand %p833_p4, %p830_p3 }
 0x3b5   :  { %838 = shalt.err (!%p835_p5)
}
 0x3b6   :  { %518 = dma.vmem_to_hbm [thread:$0]  %s513_s4, 256, %s1070_s11, [#allocation13], %s851_s3, %s851_s3, %s852_s20  }
 0x3b7   :  { %843 = dma.done.wait [#allocation7], 128  }
 0x3b8   :  { %844 = vsyncadd [#allocation7], 4294967168 }
 0x3b9   :  { %845 = dma.done.wait [#allocation13], 384  }
 0x3ba   :  { %846 = vsyncadd [#allocation13], 4294966912 }
 0x3bb   :  { %528 = vsyncpa [#allocation6], 1 }
 0x3bc   :  { %529 = vsyncpa [#allocation9], 1 }
 0x3bd   :  { %530 = vsyncpa [#allocation7], 1 }
 0x3be   :  { %531 = vsyncpa [#allocation13], 1 }

</bundles_post_ra>
